<compile_context>
chip_gen: v5e
topology: v5e:2x2
jax: 0.10.0
libtpu: 0.0.40
codegen_flags: <defaults>
</compile_context>

<pallas_src>
import functools

import jax
import jax.numpy as jnp
from jax.experimental import pallas as pl
from jax.experimental.pallas import tpu as pltpu

LANE = 128     # lane width: last dim of every tile padded to a multiple of this
SUBLANE = 8    # sublane granularity for the batch (second-to-last) dim


def _round_up(n, m):
    return ((n + m - 1) // m) * m


def _cdiv(a, b):
    return -(-a // b)


# -----------------------------------------------------------------------------
# Generation-aware budgets.
# -----------------------------------------------------------------------------
def _tpu_budget():
    """Returns (vmem_budget_bytes, tensorcores_per_chip)."""
    try:
        kind = jax.devices()[0].device_kind.lower()
    except Exception:  # pragma: no cover - defensive
        kind = ""
    if ("v5 lite" in kind) or ("v5e" in kind) or ("v6" in kind):
        return 100 * 1024 * 1024, 1      # 128 MiB physical VMEM, 1 TC
    if "7" in kind:
        return 48 * 1024 * 1024, 2       # v7x: 64 MiB per TC, 2 TCs
    return 48 * 1024 * 1024, 1           # unknown generation: conservative


# -----------------------------------------------------------------------------
# Kernel: one batch tile, whole (padded) MLP resident in VMEM.
# -----------------------------------------------------------------------------
def mlp_kernel(x_ref, w1_ref, b1_ref, w2_ref, b2_ref, w3_ref, b3_ref, o_ref):
    x = x_ref[...]                                                     # bf16 [tb, Fp]
    h1 = jnp.tanh(
        jnp.dot(x, w1_ref[...], preferred_element_type=jnp.float32) + b1_ref[...]
    )                                                                  # f32 [tb, Hp]
    h2 = jnp.tanh(
        jnp.dot(h1.astype(jnp.bfloat16), w2_ref[...],
                preferred_element_type=jnp.float32) + b2_ref[...]
    )                                                                  # f32 [tb, Hp]
    out = jnp.dot(h2.astype(jnp.bfloat16), w3_ref[...],
                  preferred_element_type=jnp.float32) + b3_ref[...]    # f32 [tb, Op]
    o_ref[...] = out.astype(o_ref.dtype)


# -----------------------------------------------------------------------------
# One-time parameter preparation (hoisted out of the per-call path).
# -----------------------------------------------------------------------------
def prepare_params(w1, b1, w2, b2, w3, b3):
    """Pad every feature dim to a multiple of 128 lanes and cast weights to bf16.

    w_i: [in, out] (x @ W layout); b_i: [out] or [1, out].
    Returns (padded_params_tuple, (F, H, O)).
    """
    def pad2(a, rows, cols):
        a = jnp.asarray(a)
        if a.ndim == 1:
            a = a[None, :]
        return jnp.pad(a, ((0, rows - a.shape[0]), (0, cols - a.shape[1])))

    F, H = w1.shape
    O = w3.shape[1]
    Fp, Hp, Op = _round_up(F, LANE), _round_up(H, LANE), _round_up(O, LANE)

    padded = (
        pad2(w1, Fp, Hp).astype(jnp.bfloat16),
        pad2(b1, 1, Hp).astype(jnp.float32),
        pad2(w2, Hp, Hp).astype(jnp.bfloat16),
        pad2(b2, 1, Hp).astype(jnp.float32),
        pad2(w3, Hp, Op).astype(jnp.bfloat16),
        pad2(b3, 1, Op).astype(jnp.float32),
    )
    return padded, (F, H, O)


# -----------------------------------------------------------------------------
# Batch tiling: balanced tiles under a generation-aware VMEM budget.
# -----------------------------------------------------------------------------
def _pick_tiling(B, Fp, Hp, Op, vmem_budget, num_tc, weight_buffers):
    Bp0 = _round_up(B, SUBLANE)

    weight_bytes = ((Fp * Hp + Hp * Hp + Hp * Op) * 2
                    + (2 * Hp + Op) * 4) * weight_buffers

    def tile_bytes(bb):
        # double-buffered x (bf16) and out (f32) tiles + live f32 intermediates
        return bb * (Fp * 2 * 2 + Op * 4 * 2 + Hp * 4 * 2)

    cap = 512                                      # rows; HBM roofline plateau
    while cap > SUBLANE and weight_bytes + tile_bytes(cap) > vmem_budget:
        cap //= 2
    cap = max(cap, SUBLANE)

    nt = max(_cdiv(Bp0, cap), 1)
    if num_tc >= 2 and Bp0 > SUBLANE:
        nt = max(nt, 2)                            # feed both v7x TensorCores
    block_b = _round_up(_cdiv(Bp0, nt), SUBLANE)   # balanced: <8 pad rows/tile
    Bp = nt * block_b
    return Bp, block_b, nt


# -----------------------------------------------------------------------------
# Forward.
# -----------------------------------------------------------------------------
@functools.partial(jax.jit, static_argnames=("n_outputs", "single_buffer_weights"))
def _mlp_forward_impl(x, w1p, b1p, w2p, b2p, w3p, b3p, *, n_outputs,
                      single_buffer_weights):
    B, F = x.shape
    Fp, Hp = w1p.shape
    Op = w3p.shape[1]

    vmem_budget, num_tc = _tpu_budget()
    wbuf = 1 if single_buffer_weights else 2
    Bp, block_b, nt = _pick_tiling(B, Fp, Hp, Op, vmem_budget, num_tc, wbuf)

    # Only the activations are padded/cast per call; jit fuses this with the
    # kernel dispatch. Zero padding is exact (see header).
    xp = jnp.pad(x.astype(jnp.bfloat16), ((0, Bp - B), (0, Fp - F)))

    def w_spec(shape):
        if single_buffer_weights:
            return pl.BlockSpec(shape, lambda i: (0, 0),
                                pipeline_mode=pl.Buffered(1))
        return pl.BlockSpec(shape, lambda i: (0, 0))

    cost = pl.CostEstimate(
        flops=2 * Bp * (Fp * Hp + Hp * Hp + Hp * Op),
        transcendentals=2 * Bp * Hp,
        bytes_accessed=(Bp * Fp * 2 + Bp * Op * 4
                        + (Fp * Hp + Hp * Hp + Hp * Op) * 2
                        + (2 * Hp + Op) * 4),
    )

    out_padded = pl.pallas_call(
        mlp_kernel,
        out_shape=jax.ShapeDtypeStruct((Bp, Op), jnp.float32),
        grid_spec=pltpu.PrefetchScalarGridSpec(
            num_scalar_prefetch=0,
            grid=(nt,),
            in_specs=[
                pl.BlockSpec((block_b, Fp), lambda i: (i, 0)),  # x: tiled over batch
                w_spec((Fp, Hp)),   # w1 (VMEM-resident, constant index map)
                w_spec((1, Hp)),    # b1
                w_spec((Hp, Hp)),   # w2
                w_spec((1, Hp)),    # b2
                w_spec((Hp, Op)),   # w3
                w_spec((1, Op)),    # b3
            ],
            # Lane-dense (multiple-of-128) output block -> unmasked stores.
            out_specs=pl.BlockSpec((block_b, Op), lambda i: (i, 0)),
        ),
        compiler_params=pltpu.CompilerParams(
            dimension_semantics=("parallel",),      # batch axis shards across TCs
            vmem_limit_bytes=vmem_budget,
        ),
        cost_estimate=cost,
    )(xp, w1p, b1p, w2p, b2p, w3p, b3p)

    # Strip batch/lane padding outside the kernel (fused under jit).
    return out_padded[:B, :n_outputs]


def mlp_forward(x, padded_params, n_outputs, single_buffer_weights=True):
    """x: [B, F] f32; padded_params from prepare_params. Returns [B, n_outputs] f32."""
    return _mlp_forward_impl(x, *padded_params, n_outputs=n_outputs,
                             single_buffer_weights=single_buffer_weights)


# -----------------------------------------------------------------------------
# Init + reference.
# -----------------------------------------------------------------------------
def init_params(key, n_features, n_hidden, n_outputs, dtype=jnp.float32):
    """Deterministic init mimicking nn.Linear (uniform +/- 1/sqrt(fan_in)),
    stored as [in, out] for x @ W."""
    ks = jax.random.split(key, 6)

    def linear(kw, kb, fan_in, fan_out):
        bound = 1.0 / jnp.sqrt(fan_in)
        w = jax.random.uniform(kw, (fan_in, fan_out), dtype, -bound, bound)
        b = jax.random.uniform(kb, (1, fan_out), dtype, -bound, bound)
        return w, b

    w1, b1 = linear(ks[0], ks[1], n_features, n_hidden)
    w2, b2 = linear(ks[2], ks[3], n_hidden, n_hidden)
    w3, b3 = linear(ks[4], ks[5], n_hidden, n_outputs)
    return w1, b1, w2, b2, w3, b3


def reference_forward(x, w1, b1, w2, b2, w3, b3):
    # Pure f32 reference (matches the PyTorch module's forward semantics).
    h1 = jnp.tanh(x @ w1 + b1)
    h2 = jnp.tanh(h1 @ w2 + b2)
    return h2 @ w3 + b3


if __name__ == "__main__":
    key = jax.random.PRNGKey(0)
    n_features, n_hidden, n_outputs = 32, 64, 16
    batch = 8

    k_x, k_p = jax.random.split(key)
    x = jax.random.normal(k_x, (batch, n_features), jnp.float32)
    raw_params = init_params(k_p, n_features, n_hidden, n_outputs)

    # Pad/cast the weights once (hoisted out of the per-call path).
    padded_params, _ = prepare_params(*raw_params)

    try:
        out = jax.block_until_ready(
            mlp_forward(x, padded_params, n_outputs, single_buffer_weights=True))
    except Exception:
        # Fallback if this JAX build rejects single-buffered (Buffered(1)) weights.
        out = jax.block_until_ready(
            mlp_forward(x, padded_params, n_outputs, single_buffer_weights=False))

    assert out.shape == (batch, n_outputs), out.shape

    # Kernel runs the matmuls in bf16 (f32 accumulation), so compare against
    # the f32 reference with a correspondingly relaxed tolerance.
    ref = reference_forward(x, *raw_params)
    assert jnp.allclose(out, ref, atol=5e-2, rtol=5e-2), "mismatch vs reference"

    print("KERNEL_OK")
</pallas_src>

<mosaic_0001>
module attributes {stable_mosaic.version = 11 : i64} {
  func.func @mlp_kernel(%arg0: i32, %arg1: memref<8x128xbf16, #tpu.memory_space<vmem>>, %arg2: memref<128x128xbf16, #tpu.memory_space<vmem>>, %arg3: memref<1x128xf32, #tpu.memory_space<vmem>>, %arg4: memref<128x128xbf16, #tpu.memory_space<vmem>>, %arg5: memref<1x128xf32, #tpu.memory_space<vmem>>, %arg6: memref<128x128xbf16, #tpu.memory_space<vmem>>, %arg7: memref<1x128xf32, #tpu.memory_space<vmem>>, %arg8: memref<8x128xf32, #tpu.memory_space<vmem>>) attributes {dimension_semantics = [#tpu.dimension_semantics<parallel>], iteration_bounds = array<i64: 1>, scalar_prefetch = 0 : i64, scratch_operands = 0 : i64, tpu.core_type = #tpu.core_type<tc>, window_params = [{transform_indices = @transform_0, window_bounds = array<i64: 8, 128>}, {pipeline_mode = #tpu.pipeline_mode<synchronous>, transform_indices = @transform_1, window_bounds = array<i64: 128, 128>}, {pipeline_mode = #tpu.pipeline_mode<synchronous>, transform_indices = @transform_2, window_bounds = array<i64: 1, 128>}, {pipeline_mode = #tpu.pipeline_mode<synchronous>, transform_indices = @transform_3, window_bounds = array<i64: 128, 128>}, {pipeline_mode = #tpu.pipeline_mode<synchronous>, transform_indices = @transform_4, window_bounds = array<i64: 1, 128>}, {pipeline_mode = #tpu.pipeline_mode<synchronous>, transform_indices = @transform_5, window_bounds = array<i64: 128, 128>}, {pipeline_mode = #tpu.pipeline_mode<synchronous>, transform_indices = @transform_6, window_bounds = array<i64: 1, 128>}, {transform_indices = @transform_7, window_bounds = array<i64: 8, 128>}]} {
    %c0 = arith.constant 0 : index
    %c0_0 = arith.constant 0 : index
    %0 = vector.load %arg1[%c0, %c0_0] : memref<8x128xbf16, #tpu.memory_space<vmem>>, vector<8x128xbf16>
    %c0_1 = arith.constant 0 : index
    %c0_2 = arith.constant 0 : index
    %1 = vector.load %arg2[%c0_1, %c0_2] : memref<128x128xbf16, #tpu.memory_space<vmem>>, vector<128x128xbf16>
    %cst = arith.constant dense<0.000000e+00> : vector<8x128xf32>
    %2 = tpu.matmul %0, %1, %cst {dimension_numbers = #tpu.dot_dimension_numbers<[1], [0], [0], [1], [0, 0, 1, 1], [], []>} : vector<8x128xbf16>, vector<128x128xbf16>, vector<8x128xf32> -> vector<8x128xf32>
    %c0_3 = arith.constant 0 : index
    %c0_4 = arith.constant 0 : index
    %3 = vector.load %arg3[%c0_3, %c0_4] : memref<1x128xf32, #tpu.memory_space<vmem>>, vector<1x128xf32>
    %4 = vector.broadcast %3 : vector<1x128xf32> to vector<8x128xf32>
    %5 = arith.addf %2, %4 : vector<8x128xf32>
    %6 = math.tanh %5 : vector<8x128xf32>
    %7 = arith.truncf %6 : vector<8x128xf32> to vector<8x128xbf16>
    %c0_5 = arith.constant 0 : index
    %c0_6 = arith.constant 0 : index
    %8 = vector.load %arg4[%c0_5, %c0_6] : memref<128x128xbf16, #tpu.memory_space<vmem>>, vector<128x128xbf16>
    %cst_7 = arith.constant dense<0.000000e+00> : vector<8x128xf32>
    %9 = tpu.matmul %7, %8, %cst_7 {dimension_numbers = #tpu.dot_dimension_numbers<[1], [0], [0], [1], [0, 0, 1, 1], [], []>} : vector<8x128xbf16>, vector<128x128xbf16>, vector<8x128xf32> -> vector<8x128xf32>
    %c0_8 = arith.constant 0 : index
    %c0_9 = arith.constant 0 : index
    %10 = vector.load %arg5[%c0_8, %c0_9] : memref<1x128xf32, #tpu.memory_space<vmem>>, vector<1x128xf32>
    %11 = vector.broadcast %10 : vector<1x128xf32> to vector<8x128xf32>
    %12 = arith.addf %9, %11 : vector<8x128xf32>
    %13 = math.tanh %12 : vector<8x128xf32>
    %14 = arith.truncf %13 : vector<8x128xf32> to vector<8x128xbf16>
    %c0_10 = arith.constant 0 : index
    %c0_11 = arith.constant 0 : index
    %15 = vector.load %arg6[%c0_10, %c0_11] : memref<128x128xbf16, #tpu.memory_space<vmem>>, vector<128x128xbf16>
    %cst_12 = arith.constant dense<0.000000e+00> : vector<8x128xf32>
    %16 = tpu.matmul %14, %15, %cst_12 {dimension_numbers = #tpu.dot_dimension_numbers<[1], [0], [0], [1], [0, 0, 1, 1], [], []>} : vector<8x128xbf16>, vector<128x128xbf16>, vector<8x128xf32> -> vector<8x128xf32>
    %c0_13 = arith.constant 0 : index
    %c0_14 = arith.constant 0 : index
    %17 = vector.load %arg7[%c0_13, %c0_14] : memref<1x128xf32, #tpu.memory_space<vmem>>, vector<1x128xf32>
    %18 = vector.broadcast %17 : vector<1x128xf32> to vector<8x128xf32>
    %19 = arith.addf %16, %18 : vector<8x128xf32>
    %c0_15 = arith.constant 0 : index
    %c0_16 = arith.constant 0 : index
    %20 = vector.load %arg8[%c0_15, %c0_16] : memref<8x128xf32, #tpu.memory_space<vmem>>, vector<8x128xf32>
    tpu.vector_store %arg8[%c0_15, %c0_16], %19 {strides = array<i32>} : memref<8x128xf32, #tpu.memory_space<vmem>>, vector<8x128xf32>,
    return
  }
  func.func @transform_0(%arg0: i32) -> (i32, i32) {
    %c0_i32 = arith.constant 0 : i32
    %c0_i32_0 = arith.constant 0 : i32
    return %arg0, %c0_i32 : i32, i32
  }
  func.func @transform_1(%arg0: i32) -> (i32, i32) {
    %c0_i32 = arith.constant 0 : i32
    %c0_i32_0 = arith.constant 0 : i32
    %c0_i32_1 = arith.constant 0 : i32
    return %c0_i32, %c0_i32_0 : i32, i32
  }
  func.func @transform_2(%arg0: i32) -> (i32, i32) {
    %c0_i32 = arith.constant 0 : i32
    %c0_i32_0 = arith.constant 0 : i32
    %c0_i32_1 = arith.constant 0 : i32
    return %c0_i32, %c0_i32_0 : i32, i32
  }
  func.func @transform_3(%arg0: i32) -> (i32, i32) {
    %c0_i32 = arith.constant 0 : i32
    %c0_i32_0 = arith.constant 0 : i32
    %c0_i32_1 = arith.constant 0 : i32
    return %c0_i32, %c0_i32_0 : i32, i32
  }
  func.func @transform_4(%arg0: i32) -> (i32, i32) {
    %c0_i32 = arith.constant 0 : i32
    %c0_i32_0 = arith.constant 0 : i32
    %c0_i32_1 = arith.constant 0 : i32
    return %c0_i32, %c0_i32_0 : i32, i32
  }
  func.func @transform_5(%arg0: i32) -> (i32, i32) {
    %c0_i32 = arith.constant 0 : i32
    %c0_i32_0 = arith.constant 0 : i32
    %c0_i32_1 = arith.constant 0 : i32
    return %c0_i32, %c0_i32_0 : i32, i32
  }
  func.func @transform_6(%arg0: i32) -> (i32, i32) {
    %c0_i32 = arith.constant 0 : i32
    %c0_i32_0 = arith.constant 0 : i32
    %c0_i32_1 = arith.constant 0 : i32
    return %c0_i32, %c0_i32_0 : i32, i32
  }
  func.func @transform_7(%arg0: i32) -> (i32, i32) {
    %c0_i32 = arith.constant 0 : i32
    %c0_i32_0 = arith.constant 0 : i32
    return %arg0, %c0_i32 : i32, i32
  }
}

module attributes {stable_mosaic.version = 11 : i64} {
  func.func @mlp_kernel(%arg0: i32, %arg1: memref<8x128xbf16, #tpu.memory_space<vmem>>, %arg2: memref<128x128xbf16, #tpu.memory_space<vmem>>, %arg3: memref<1x128xf32, #tpu.memory_space<vmem>>, %arg4: memref<128x128xbf16, #tpu.memory_space<vmem>>, %arg5: memref<1x128xf32, #tpu.memory_space<vmem>>, %arg6: memref<128x128xbf16, #tpu.memory_space<vmem>>, %arg7: memref<1x128xf32, #tpu.memory_space<vmem>>, %arg8: memref<8x128xf32, #tpu.memory_space<vmem>>) attributes {dimension_semantics = [#tpu.dimension_semantics<parallel>], iteration_bounds = array<i64: 1>, scalar_prefetch = 0 : i64, scratch_operands = 0 : i64, tpu.core_type = #tpu.core_type<tc>, window_params = [{transform_indices = @transform_0, window_bounds = array<i64: 8, 128>}, {pipeline_mode = #tpu.pipeline_mode<synchronous>, transform_indices = @transform_1, window_bounds = array<i64: 128, 128>}, {pipeline_mode = #tpu.pipeline_mode<synchronous>, transform_indices = @transform_2, window_bounds = array<i64: 1, 128>}, {pipeline_mode = #tpu.pipeline_mode<synchronous>, transform_indices = @transform_3, window_bounds = array<i64: 128, 128>}, {pipeline_mode = #tpu.pipeline_mode<synchronous>, transform_indices = @transform_4, window_bounds = array<i64: 1, 128>}, {pipeline_mode = #tpu.pipeline_mode<synchronous>, transform_indices = @transform_5, window_bounds = array<i64: 128, 128>}, {pipeline_mode = #tpu.pipeline_mode<synchronous>, transform_indices = @transform_6, window_bounds = array<i64: 1, 128>}, {transform_indices = @transform_7, window_bounds = array<i64: 8, 128>}]} {
    %c0 = arith.constant 0 : index
    %c0_0 = arith.constant 0 : index
    %0 = vector.load %arg1[%c0, %c0_0] : memref<8x128xbf16, #tpu.memory_space<vmem>>, vector<8x128xbf16>
    %c0_1 = arith.constant 0 : index
    %c0_2 = arith.constant 0 : index
    %1 = vector.load %arg2[%c0_1, %c0_2] : memref<128x128xbf16, #tpu.memory_space<vmem>>, vector<128x128xbf16>
    %cst = arith.constant dense<0.000000e+00> : vector<8x128xf32>
    %2 = tpu.matmul %0, %1, %cst {dimension_numbers = #tpu.dot_dimension_numbers<[1], [0], [0], [1], [0, 0, 1, 1], [], []>} : vector<8x128xbf16>, vector<128x128xbf16>, vector<8x128xf32> -> vector<8x128xf32>
    %c0_3 = arith.constant 0 : index
    %c0_4 = arith.constant 0 : index
    %3 = vector.load %arg3[%c0_3, %c0_4] : memref<1x128xf32, #tpu.memory_space<vmem>>, vector<1x128xf32>
    %4 = vector.broadcast %3 : vector<1x128xf32> to vector<8x128xf32>
    %5 = arith.addf %2, %4 : vector<8x128xf32>
    %6 = math.tanh %5 : vector<8x128xf32>
    %7 = arith.truncf %6 : vector<8x128xf32> to vector<8x128xbf16>
    %c0_5 = arith.constant 0 : index
    %c0_6 = arith.constant 0 : index
    %8 = vector.load %arg4[%c0_5, %c0_6] : memref<128x128xbf16, #tpu.memory_space<vmem>>, vector<128x128xbf16>
    %cst_7 = arith.constant dense<0.000000e+00> : vector<8x128xf32>
    %9 = tpu.matmul %7, %8, %cst_7 {dimension_numbers = #tpu.dot_dimension_numbers<[1], [0], [0], [1], [0, 0, 1, 1], [], []>} : vector<8x128xbf16>, vector<128x128xbf16>, vector<8x128xf32> -> vector<8x128xf32>
    %c0_8 = arith.constant 0 : index
    %c0_9 = arith.constant 0 : index
    %10 = vector.load %arg5[%c0_8, %c0_9] : memref<1x128xf32, #tpu.memory_space<vmem>>, vector<1x128xf32>
    %11 = vector.broadcast %10 : vector<1x128xf32> to vector<8x128xf32>
    %12 = arith.addf %9, %11 : vector<8x128xf32>
    %13 = math.tanh %12 : vector<8x128xf32>
    %14 = arith.truncf %13 : vector<8x128xf32> to vector<8x128xbf16>
    %c0_10 = arith.constant 0 : index
    %c0_11 = arith.constant 0 : index
    %15 = vector.load %arg6[%c0_10, %c0_11] : memref<128x128xbf16, #tpu.memory_space<vmem>>, vector<128x128xbf16>
    %cst_12 = arith.constant dense<0.000000e+00> : vector<8x128xf32>
    %16 = tpu.matmul %14, %15, %cst_12 {dimension_numbers = #tpu.dot_dimension_numbers<[1], [0], [0], [1], [0, 0, 1, 1], [], []>} : vector<8x128xbf16>, vector<128x128xbf16>, vector<8x128xf32> -> vector<8x128xf32>
    %c0_13 = arith.constant 0 : index
    %c0_14 = arith.constant 0 : index
    %17 = vector.load %arg7[%c0_13, %c0_14] : memref<1x128xf32, #tpu.memory_space<vmem>>, vector<1x128xf32>
    %18 = vector.broadcast %17 : vector<1x128xf32> to vector<8x128xf32>
    %19 = arith.addf %16, %18 : vector<8x128xf32>
    %c0_15 = arith.constant 0 : index
    %c0_16 = arith.constant 0 : index
    %20 = vector.load %arg8[%c0_15, %c0_16] : memref<8x128xf32, #tpu.memory_space<vmem>>, vector<8x128xf32>
    tpu.vector_store %arg8[%c0_15, %c0_16], %19 {strides = array<i32>} : memref<8x128xf32, #tpu.memory_space<vmem>>, vector<8x128xf32>,
    return
  }
  func.func @transform_0(%arg0: i32) -> (i32, i32) {
    %c0_i32 = arith.constant 0 : i32
    %c0_i32_0 = arith.constant 0 : i32
    return %arg0, %c0_i32 : i32, i32
  }
  func.func @transform_1(%arg0: i32) -> (i32, i32) {
    %c0_i32 = arith.constant 0 : i32
    %c0_i32_0 = arith.constant 0 : i32
    %c0_i32_1 = arith.constant 0 : i32
    return %c0_i32, %c0_i32_0 : i32, i32
  }
  func.func @transform_2(%arg0: i32) -> (i32, i32) {
    %c0_i32 = arith.constant 0 : i32
    %c0_i32_0 = arith.constant 0 : i32
    %c0_i32_1 = arith.constant 0 : i32
    return %c0_i32, %c0_i32_0 : i32, i32
  }
  func.func @transform_3(%arg0: i32) -> (i32, i32) {
    %c0_i32 = arith.constant 0 : i32
    %c0_i32_0 = arith.constant 0 : i32
    %c0_i32_1 = arith.constant 0 : i32
    return %c0_i32, %c0_i32_0 : i32, i32
  }
  func.func @transform_4(%arg0: i32) -> (i32, i32) {
    %c0_i32 = arith.constant 0 : i32
    %c0_i32_0 = arith.constant 0 : i32
    %c0_i32_1 = arith.constant 0 : i32
    return %c0_i32, %c0_i32_0 : i32, i32
  }
  func.func @transform_5(%arg0: i32) -> (i32, i32) {
    %c0_i32 = arith.constant 0 : i32
    %c0_i32_0 = arith.constant 0 : i32
    %c0_i32_1 = arith.constant 0 : i32
    return %c0_i32, %c0_i32_0 : i32, i32
  }
  func.func @transform_6(%arg0: i32) -> (i32, i32) {
    %c0_i32 = arith.constant 0 : i32
    %c0_i32_0 = arith.constant 0 : i32
    %c0_i32_1 = arith.constant 0 : i32
    return %c0_i32, %c0_i32_0 : i32, i32
  }
  func.func @transform_7(%arg0: i32) -> (i32, i32) {
    %c0_i32 = arith.constant 0 : i32
    %c0_i32_0 = arith.constant 0 : i32
    return %arg0, %c0_i32 : i32, i32
  }
}

</mosaic_0001>

<bundles_post_ra>
// kernel: _mlp_forward_impl.1
= control target key start
LH: loop header
LB: loop body
LE: loop exit
PB: predicated region body
PF: predicated region fallthrough
CT: control target
= control target key end

     0   :  { %12 = vsyncpa [#allocation3], 0  ;;  %s646_s0 = inlined_call_operand.vmem [shape: bf16[8,128], index: 0, kind: input, shape index: {}]   ;;  %s647_s1 = inlined_call_operand.hbm [shape: bf16[128,128], index: 1, kind: input, shape index: {}]   ;;  %s648_s2 = inlined_call_operand.vmem [shape: f32[1,128], index: 2, kind: input, shape index: {}]   ;;  %s649_s3 = inlined_call_operand.hbm [shape: bf16[128,128], index: 3, kind: input, shape index: {}]   ;;  %s650_s4 = inlined_call_operand.vmem [shape: f32[1,128], index: 4, kind: input, shape index: {}]   ;;  %s651_s5 = inlined_call_operand.hbm [shape: bf16[128,128], index: 5, kind: input, shape index: {}]   ;;  %s652_s6 = inlined_call_operand.vmem [shape: f32[1,128], index: 6, kind: input, shape index: {}]   ;;  %s653_s7 = inlined_call_operand.hbm [shape: f32[8,128], index: 7, kind: output, shape index: {}]  }
   0x1   :  { %13 = vsyncpa [#allocation6], 0 }
   0x2   :  { %14 = vsyncpa [#allocation4], 0  ;;  %s36_s26 = sshll.u32 %s649_s3, 4  ;;  %s576_s27 = smov [#allocation5]   ;;  %s37_s26 = int_to_ptr.hbm [resolvable:$true] %s36_s26 }
   0x3   :  { %s38_s28 = sshll.u32 %s576_s27, 4  ;;  %s21_s8 = sshll.u32 %s647_s1, 4  ;;  %s39_s28 = int_to_ptr.vmem [resolvable:$true] %s38_s28  ;;  %s22_s8 = int_to_ptr.hbm [resolvable:$true] %s21_s8 }
   0x4   :  { %s577_s9 = smov 64   ;;  %s578_s10 = smov 4  }
   0x5   :  { %44 = dma.hbm_to_vmem [thread:$0]  %s37_s26, 1024, %s39_s28, [#allocation6], %s577_s9, %s577_s9, %s578_s10  }
   0x6   :  { %s579_s11 = smov [#allocation2]   ;;  %s51_s15 = sshll.u32 %s651_s5, 4  ;;  %s52_s15 = int_to_ptr.hbm [resolvable:$true] %s51_s15 }
   0x7   :  { %s23_s12 = sshll.u32 %s579_s11, 4  ;;  %s580_s3 = smov [#allocation7]   ;;  %s24_s12 = int_to_ptr.vmem [resolvable:$true] %s23_s12 }
   0x8   :  { %29 = dma.hbm_to_vmem [thread:$0]  %s22_s8, 1024, %s24_s12, [#allocation3], %s577_s9, %s577_s9, %s578_s10  }
   0x9   :  { %s53_s16 = sshll.u32 %s580_s3, 4  ;;  %s54_s16 = int_to_ptr.vmem [resolvable:$true] %s53_s16 }
   0xa   :  { %59 = dma.hbm_to_vmem [thread:$0]  %s52_s15, 1024, %s54_s16, [#allocation6], %s577_s9, %s577_s9, %s578_s10  }
   0xb   :  { %570 = dma.done.wait [#allocation3], 1024  }
   0xc   :  { %571 = vsyncadd [#allocation3], 4294966272 }
   0xd   :  { %572 = dma.done.wait [#allocation6], 2048  }
   0xe   :  { %573 = vsyncadd [#allocation6], 4294965248  ;;  %v444_v0 = vld [vmem:[#allocation2 + $0x38] sm:$0xff]  ;;  %v443_v1 = vld [vmem:[#allocation2 + $0x30] sm:$0xff]  ;;  %s581_s21 = smov [#allocation8]   ;;  %s330_s25 = sshll.u32 %s653_s7, 4  ;;  %s331_s25 = int_to_ptr.hbm [resolvable:$true] %s330_s25 }
   0xf   :  { %143 = vmatpush.bf16.msra.mxu0 %v444_v0  ;;  %v452_v2 = vld [vmem:[#allocation5 + $0x38] sm:$0xff]  ;;  %v451_v3 = vld [vmem:[#allocation5 + $0x30] sm:$0xff]  ;;  %v442_v4 = vld [vmem:[#allocation2 + $0x28] sm:$0xff]  ;;  %s328_s22 = sshll.u32 %s581_s21, 4  ;;  %s329_s22 = int_to_ptr.vmem [resolvable:$true] %s328_s22 }
  0x10   :  { %226 = vmatpush.bf16.msra.mxu1 %v452_v2  ;;  %v450_v5 = vld [vmem:[#allocation5 + $0x28] sm:$0xff]  ;;  %v441_v6 = vld [vmem:[#allocation2 + $0x20] sm:$0xff]  ;;  %v440_v8 = vld [vmem:[#allocation2 + $0x18] sm:$0xff] }
  0x11   :  { %v449_v7 = vld [vmem:[#allocation5 + $0x20] sm:$0xff]  ;;  %v448_v9 = vld [vmem:[#allocation5 + $0x18] sm:$0xff]  ;;  %v439_v10 = vld [vmem:[#allocation2 + $0x10] sm:$0xff] }
  0x12   :  { %v438_v11 = vld [vmem:[#allocation2 + $0x8] sm:$0xff]  ;;  %v437_v12 = vld [vmem:[#allocation2] sm:$0xff]  ;;  %v447_v14 = vld [vmem:[#allocation5 + $0x10] sm:$0xff] }
  0x13   :  { %144 = vmatpush.bf16.msra.mxu0 %v443_v1  ;;  %v74_v13 = vld [vmem:[%s646_s0] sm:$0xf]  ;;  %v446_v15 = vld [vmem:[#allocation5 + $0x8] sm:$0xff]  ;;  %v460_v17 = vld [vmem:[#allocation7 + $0x38] sm:$0xff] }
  0x14   :  { %227 = vmatpush.bf16.msra.mxu1 %v451_v3  ;;  %v445_v16 = vld [vmem:[#allocation5] sm:$0xff]  ;;  %309 = vmatpush.bf16.msra.mxu2 %v460_v17  ;;  %v459_v18 = vld [vmem:[#allocation7 + $0x30] sm:$0xff]  ;;  %v458_v19 = vld [vmem:[#allocation7 + $0x28] sm:$0xff] }
  0x15   :  { %v457_v20 = vld [vmem:[#allocation7 + $0x20] sm:$0xff]  ;;  %v456_v21 = vld [vmem:[#allocation7 + $0x18] sm:$0xff]  ;;  %v455_v28 = vld [vmem:[#allocation7 + $0x10] sm:$0xff] }
  0x16   :  { %v467_v22 = vld [vmem:[%s648_s2] ss:$0 sm:$0xff]  ;;  %v454_v29 = vld [vmem:[#allocation7 + $0x8] sm:$0xff] }
  0x17   :  { %145 = vmatpush.bf16.msra.mxu0 %v442_v4  ;;  %v453_v30 = vld [vmem:[#allocation7] sm:$0xff] }
  0x18   :  { %228 = vmatpush.bf16.msra.mxu1 %v450_v5  ;;  %310 = vmatpush.bf16.msra.mxu2 %v459_v18  ;;  %v468_v31 = vld [vmem:[%s650_s4] ss:$0 sm:$0xff] }
  0x19   :  { %v469_v37 = vld [vmem:[%s652_s6] ss:$0 sm:$0xff] }
  0x1b   :  { %146 = vmatpush.bf16.msra.mxu0 %v441_v6 }
  0x1c   :  { %229 = vmatpush.bf16.msra.mxu1 %v449_v7  ;;  %311 = vmatpush.bf16.msra.mxu2 %v458_v19 }
  0x1f   :  { %147 = vmatpush.bf16.msra.mxu0 %v440_v8 }
  0x20   :  { %230 = vmatpush.bf16.msra.mxu1 %v448_v9  ;;  %312 = vmatpush.bf16.msra.mxu2 %v457_v20 }
  0x23   :  { %148 = vmatpush.bf16.msra.mxu0 %v439_v10 }
  0x24   :  { %231 = vmatpush.bf16.msra.mxu1 %v447_v14  ;;  %313 = vmatpush.bf16.msra.mxu2 %v456_v21 }
  0x27   :  { %149 = vmatpush.bf16.msra.mxu0 %v438_v11 }
  0x28   :  { %232 = vmatpush.bf16.msra.mxu1 %v446_v15  ;;  %314 = vmatpush.bf16.msra.mxu2 %v455_v28 }
  0x2b   :  { %150 = vmatpush.bf16.msra.mxu0 %v437_v12 }
  0x2c   :  { %233 = vmatpush.bf16.msra.mxu1 %v445_v16  ;;  %315 = vmatpush.bf16.msra.mxu2 %v454_v29 }
  0x2e   :  { %151 = vmatmul.bf16.vlgmr.msra.gmra.mxu0 %v74_v13 }
  0x30   :  { %316 = vmatpush.bf16.msra.mxu2 %v453_v30 }
  0xab   :  { %v152_v23 = vpop.f32.mrf.mxu0 }
  0xac   :  { %v153_v24 = vadd.f32 %v467_v22, %v152_v23 }
  0xae   :  { %470 = vtanh.f32 %v153_v24 }
  0xb3   :  { %v154_v25 = vpop.f32.mrf.mxu0 }
  0xb4   :  { %v471_v26 = vpop.eup %470 }
  0xb5   :  { %v157_v27 = vpack.c.bf16 %v471_v26, %v471_v26 }
  0xb7   :  { %234 = vmatmul.bf16.vlgmr.msra.gmra.mxu1 %v157_v27 }
 0x134   :  { %v235_v32 = vpop.f32.mrf.mxu1 }
 0x135   :  { %v236_v33 = vadd.f32 %v468_v31, %v235_v32 }
 0x137   :  { %472 = vtanh.f32 %v236_v33 }
 0x13c   :  { %v237_v34 = vpop.f32.mrf.mxu1 }
 0x13d   :  { %v473_v35 = vpop.eup %472 }
 0x13e   :  { %v240_v36 = vpack.c.bf16 %v473_v35, %v473_v35 }
 0x140   :  { %317 = vmatmul.bf16.vlgmr.msra.gmra.mxu2 %v240_v36 }
 0x1c3   :  { %v318_v38 = vpop.f32.mrf.mxu2 }
 0x1c4   :  { %v319_v39 = vadd.f32 %v469_v37, %v318_v38 }
 0x1c6   :  { %322 = vst [vmem:[#allocation8] sm:$0xff] %v319_v39 }
 0x1c7   :  { %333 = dma.vmem_to_hbm [thread:$0]  %s329_s22, 128, %s331_s25, [#allocation4]  }
 0x1cb   :  { %v320_v40 = vpop.f32.mrf.mxu2 }
 0x1cc   :  { %574 = dma.done.wait [#allocation4], 128  }
 0x1cd   :  { %575 = vsyncadd [#allocation4], 4294967168 }
 0x1ce   :  { %338 = vsyncpa [#allocation3], 1 }
 0x1cf   :  { %339 = vsyncpa [#allocation6], 1 }
 0x1d0   :  { %340 = vsyncpa [#allocation4], 1 }

// kernel: _mlp_forward_impl.1
= control target key start
LH: loop header
LB: loop body
LE: loop exit
PB: predicated region body
PF: predicated region fallthrough
CT: control target
= control target key end

     0   :  { %12 = vsyncpa [#allocation3], 0  ;;  %s646_s0 = inlined_call_operand.vmem [shape: bf16[8,128], index: 0, kind: input, shape index: {}]   ;;  %s647_s1 = inlined_call_operand.hbm [shape: bf16[128,128], index: 1, kind: input, shape index: {}]   ;;  %s648_s2 = inlined_call_operand.vmem [shape: f32[1,128], index: 2, kind: input, shape index: {}]   ;;  %s649_s3 = inlined_call_operand.hbm [shape: bf16[128,128], index: 3, kind: input, shape index: {}]   ;;  %s650_s4 = inlined_call_operand.vmem [shape: f32[1,128], index: 4, kind: input, shape index: {}]   ;;  %s651_s5 = inlined_call_operand.hbm [shape: bf16[128,128], index: 5, kind: input, shape index: {}]   ;;  %s652_s6 = inlined_call_operand.vmem [shape: f32[1,128], index: 6, kind: input, shape index: {}]   ;;  %s653_s7 = inlined_call_operand.hbm [shape: f32[8,128], index: 7, kind: output, shape index: {}]  }
   0x1   :  { %13 = vsyncpa [#allocation6], 0 }
   0x2   :  { %14 = vsyncpa [#allocation4], 0  ;;  %s36_s26 = sshll.u32 %s649_s3, 4  ;;  %s576_s27 = smov [#allocation5]   ;;  %s37_s26 = int_to_ptr.hbm [resolvable:$true] %s36_s26 }
   0x3   :  { %s38_s28 = sshll.u32 %s576_s27, 4  ;;  %s21_s8 = sshll.u32 %s647_s1, 4  ;;  %s39_s28 = int_to_ptr.vmem [resolvable:$true] %s38_s28  ;;  %s22_s8 = int_to_ptr.hbm [resolvable:$true] %s21_s8 }
   0x4   :  { %s577_s9 = smov 64   ;;  %s578_s10 = smov 4  }
   0x5   :  { %44 = dma.hbm_to_vmem [thread:$0]  %s37_s26, 1024, %s39_s28, [#allocation6], %s577_s9, %s577_s9, %s578_s10  }
   0x6   :  { %s579_s11 = smov [#allocation2]   ;;  %s51_s15 = sshll.u32 %s651_s5, 4  ;;  %s52_s15 = int_to_ptr.hbm [resolvable:$true] %s51_s15 }
   0x7   :  { %s23_s12 = sshll.u32 %s579_s11, 4  ;;  %s580_s3 = smov [#allocation7]   ;;  %s24_s12 = int_to_ptr.vmem [resolvable:$true] %s23_s12 }
   0x8   :  { %29 = dma.hbm_to_vmem [thread:$0]  %s22_s8, 1024, %s24_s12, [#allocation3], %s577_s9, %s577_s9, %s578_s10  }
   0x9   :  { %s53_s16 = sshll.u32 %s580_s3, 4  ;;  %s54_s16 = int_to_ptr.vmem [resolvable:$true] %s53_s16 }
   0xa   :  { %59 = dma.hbm_to_vmem [thread:$0]  %s52_s15, 1024, %s54_s16, [#allocation6], %s577_s9, %s577_s9, %s578_s10  }
   0xb   :  { %570 = dma.done.wait [#allocation3], 1024  }
   0xc   :  { %571 = vsyncadd [#allocation3], 4294966272 }
   0xd   :  { %572 = dma.done.wait [#allocation6], 2048  }
   0xe   :  { %573 = vsyncadd [#allocation6], 4294965248  ;;  %v444_v0 = vld [vmem:[#allocation2 + $0x38] sm:$0xff]  ;;  %v443_v1 = vld [vmem:[#allocation2 + $0x30] sm:$0xff]  ;;  %s581_s21 = smov [#allocation8]   ;;  %s330_s25 = sshll.u32 %s653_s7, 4  ;;  %s331_s25 = int_to_ptr.hbm [resolvable:$true] %s330_s25 }
   0xf   :  { %143 = vmatpush.bf16.msra.mxu0 %v444_v0  ;;  %v452_v2 = vld [vmem:[#allocation5 + $0x38] sm:$0xff]  ;;  %v451_v3 = vld [vmem:[#allocation5 + $0x30] sm:$0xff]  ;;  %v442_v4 = vld [vmem:[#allocation2 + $0x28] sm:$0xff]  ;;  %s328_s22 = sshll.u32 %s581_s21, 4  ;;  %s329_s22 = int_to_ptr.vmem [resolvable:$true] %s328_s22 }
  0x10   :  { %226 = vmatpush.bf16.msra.mxu1 %v452_v2  ;;  %v450_v5 = vld [vmem:[#allocation5 + $0x28] sm:$0xff]  ;;  %v441_v6 = vld [vmem:[#allocation2 + $0x20] sm:$0xff]  ;;  %v440_v8 = vld [vmem:[#allocation2 + $0x18] sm:$0xff] }
  0x11   :  { %v449_v7 = vld [vmem:[#allocation5 + $0x20] sm:$0xff]  ;;  %v448_v9 = vld [vmem:[#allocation5 + $0x18] sm:$0xff]  ;;  %v439_v10 = vld [vmem:[#allocation2 + $0x10] sm:$0xff] }
  0x12   :  { %v438_v11 = vld [vmem:[#allocation2 + $0x8] sm:$0xff]  ;;  %v437_v12 = vld [vmem:[#allocation2] sm:$0xff]  ;;  %v447_v14 = vld [vmem:[#allocation5 + $0x10] sm:$0xff] }
  0x13   :  { %144 = vmatpush.bf16.msra.mxu0 %v443_v1  ;;  %v74_v13 = vld [vmem:[%s646_s0] sm:$0xf]  ;;  %v446_v15 = vld [vmem:[#allocation5 + $0x8] sm:$0xff]  ;;  %v460_v17 = vld [vmem:[#allocation7 + $0x38] sm:$0xff] }
  0x14   :  { %227 = vmatpush.bf16.msra.mxu1 %v451_v3  ;;  %v445_v16 = vld [vmem:[#allocation5] sm:$0xff]  ;;  %309 = vmatpush.bf16.msra.mxu2 %v460_v17  ;;  %v459_v18 = vld [vmem:[#allocation7 + $0x30] sm:$0xff]  ;;  %v458_v19 = vld [vmem:[#allocation7 + $0x28] sm:$0xff] }
  0x15   :  { %v457_v20 = vld [vmem:[#allocation7 + $0x20] sm:$0xff]  ;;  %v456_v21 = vld [vmem:[#allocation7 + $0x18] sm:$0xff]  ;;  %v455_v28 = vld [vmem:[#allocation7 + $0x10] sm:$0xff] }
  0x16   :  { %v467_v22 = vld [vmem:[%s648_s2] ss:$0 sm:$0xff]  ;;  %v454_v29 = vld [vmem:[#allocation7 + $0x8] sm:$0xff] }
  0x17   :  { %145 = vmatpush.bf16.msra.mxu0 %v442_v4  ;;  %v453_v30 = vld [vmem:[#allocation7] sm:$0xff] }
  0x18   :  { %228 = vmatpush.bf16.msra.mxu1 %v450_v5  ;;  %310 = vmatpush.bf16.msra.mxu2 %v459_v18  ;;  %v468_v31 = vld [vmem:[%s650_s4] ss:$0 sm:$0xff] }
  0x19   :  { %v469_v37 = vld [vmem:[%s652_s6] ss:$0 sm:$0xff] }
  0x1b   :  { %146 = vmatpush.bf16.msra.mxu0 %v441_v6 }
  0x1c   :  { %229 = vmatpush.bf16.msra.mxu1 %v449_v7  ;;  %311 = vmatpush.bf16.msra.mxu2 %v458_v19 }
  0x1f   :  { %147 = vmatpush.bf16.msra.mxu0 %v440_v8 }
  0x20   :  { %230 = vmatpush.bf16.msra.mxu1 %v448_v9  ;;  %312 = vmatpush.bf16.msra.mxu2 %v457_v20 }
  0x23   :  { %148 = vmatpush.bf16.msra.mxu0 %v439_v10 }
  0x24   :  { %231 = vmatpush.bf16.msra.mxu1 %v447_v14  ;;  %313 = vmatpush.bf16.msra.mxu2 %v456_v21 }
  0x27   :  { %149 = vmatpush.bf16.msra.mxu0 %v438_v11 }
  0x28   :  { %232 = vmatpush.bf16.msra.mxu1 %v446_v15  ;;  %314 = vmatpush.bf16.msra.mxu2 %v455_v28 }
  0x2b   :  { %150 = vmatpush.bf16.msra.mxu0 %v437_v12 }
  0x2c   :  { %233 = vmatpush.bf16.msra.mxu1 %v445_v16  ;;  %315 = vmatpush.bf16.msra.mxu2 %v454_v29 }
  0x2e   :  { %151 = vmatmul.bf16.vlgmr.msra.gmra.mxu0 %v74_v13 }
  0x30   :  { %316 = vmatpush.bf16.msra.mxu2 %v453_v30 }
  0xab   :  { %v152_v23 = vpop.f32.mrf.mxu0 }
  0xac   :  { %v153_v24 = vadd.f32 %v467_v22, %v152_v23 }
  0xae   :  { %470 = vtanh.f32 %v153_v24 }
  0xb3   :  { %v154_v25 = vpop.f32.mrf.mxu0 }
  0xb4   :  { %v471_v26 = vpop.eup %470 }
  0xb5   :  { %v157_v27 = vpack.c.bf16 %v471_v26, %v471_v26 }
  0xb7   :  { %234 = vmatmul.bf16.vlgmr.msra.gmra.mxu1 %v157_v27 }
 0x134   :  { %v235_v32 = vpop.f32.mrf.mxu1 }
 0x135   :  { %v236_v33 = vadd.f32 %v468_v31, %v235_v32 }
 0x137   :  { %472 = vtanh.f32 %v236_v33 }
 0x13c   :  { %v237_v34 = vpop.f32.mrf.mxu1 }
 0x13d   :  { %v473_v35 = vpop.eup %472 }
 0x13e   :  { %v240_v36 = vpack.c.bf16 %v473_v35, %v473_v35 }
 0x140   :  { %317 = vmatmul.bf16.vlgmr.msra.gmra.mxu2 %v240_v36 }
 0x1c3   :  { %v318_v38 = vpop.f32.mrf.mxu2 }
 0x1c4   :  { %v319_v39 = vadd.f32 %v469_v37, %v318_v38 }
 0x1c6   :  { %322 = vst [vmem:[#allocation8] sm:$0xff] %v319_v39 }
 0x1c7   :  { %333 = dma.vmem_to_hbm [thread:$0]  %s329_s22, 128, %s331_s25, [#allocation4]  }
 0x1cb   :  { %v320_v40 = vpop.f32.mrf.mxu2 }
 0x1cc   :  { %574 = dma.done.wait [#allocation4], 128  }
 0x1cd   :  { %575 = vsyncadd [#allocation4], 4294967168 }
 0x1ce   :  { %338 = vsyncpa [#allocation3], 1 }
 0x1cf   :  { %339 = vsyncpa [#allocation6], 1 }
 0x1d0   :  { %340 = vsyncpa [#allocation4], 1 }

</bundles_post_ra>
